<compile_context>
chip_gen: v7x
topology: tpu7x:2x2x1
jax: 0.10.0
libtpu: 0.0.40
codegen_flags: <defaults>
</compile_context>

<pallas_src>
import functools

import jax
import jax.numpy as jnp
from jax.experimental import pallas as pl
from jax.experimental.pallas import tpu as pltpu


def _geom_gcn_kernel(whT_ref, adj_ref, ndst_ref, o_ref, acc_ref, *,
                     num_divisions, out_feats):
    # whT_ref : (1, D*O, tile_k) bf16    this head's projected features, transposed
    # adj_ref : (D, tile_k, tile_n) bf16 adj[d, u, v] = 1 iff edge u->v in division d
    # ndst_ref: (1, tile_n) f32          destination-node norm for this dst tile
    # o_ref   : (tile_n, D*O) f32        output block for (dst tile, head)
    # acc_ref : (H, D*O, tile_n) f32     per-head accumulators (persistent scratch)
    k = pl.program_id(1)
    h = pl.program_id(2)
    n_k = pl.num_programs(1)
    do = num_divisions * out_feats
    tile_n = o_ref.shape[0]

    @pl.when(k == 0)
    def _init():
        acc_ref[h] = jnp.zeros((do, tile_n), jnp.float32)

    # Per-division aggregation in transposed orientation: output has tile_n lanes
    # (full MXU lane width) instead of out_feats lanes.
    parts = []
    for d in range(num_divisions):
        whT_d = whT_ref[0, d * out_feats:(d + 1) * out_feats, :]      # (O, tile_k) bf16
        parts.append(jnp.dot(whT_d, adj_ref[d],                       # (tile_k, tile_n)
                             preferred_element_type=jnp.float32))     # (O, tile_n) f32
    acc_ref[h] = acc_ref[h] + jnp.concatenate(parts, axis=0)          # (D*O, tile_n)

    @pl.when(k == n_k - 1)
    def _finalize():
        # Destination norm + ReLU in the transposed layout, then one XLU
        # transpose and a single unmasked lane-dense store of the slab.
        res = jnp.maximum(acc_ref[h] * ndst_ref[...], 0.0)            # (D*O, tile_n)
        o_ref[...] = jnp.transpose(res, (1, 0))                       # (tile_n, D*O)


def _round_up(a, b):
    return ((a + b - 1) // b) * b


def _pick_config(tile):
    """Generation-aware tile size and VMEM limit."""
    try:
        cap = pltpu.get_tpu_info().vmem_capacity_bytes
    except Exception:
        cap = 128 * 1024 * 1024
    if tile is None:
        # v7x has only 64 MiB per TensorCore -> smaller default tile.
        tile = 128 if cap <= 64 * 1024 * 1024 else 256
    vmem_limit = min((int(cap) * 3) // 4, 112 * 1024 * 1024)
    return tile, vmem_limit


def geom_gcn_forward(x, norm, weights, adj, *, tile=None):
    """x: (N, F) f32; norm: (N, 1) f32; weights: (H, D, F, O) f32 (pre-transposed,
    i.e. projection is x @ W); adj: (D, N, N) with adj[d, u, v] = 1 iff edge u->v
    is in division d. Returns (N, H*D*O) f32 (divisions, then heads, concatenated)."""
    H, D, F, O = weights.shape
    N = x.shape[0]
    DO = D * O
    assert DO % 128 == 0 or H == 1, \
        "D*out_feats must be a multiple of 128 when num_heads > 1"

    tile, vmem_limit = _pick_config(tile)
    tile = min(tile, _round_up(N, 128))
    Np = _round_up(N, tile)

    x = x.astype(jnp.float32)
    norm = norm.astype(jnp.float32)
    if Np != N:
        pad = Np - N
        x = jnp.pad(x, ((0, pad), (0, 0)))
        norm = jnp.pad(norm, ((0, pad), (0, 0)))
        adj = jnp.pad(adj, ((0, 0), (0, pad), (0, pad)))

    # Hoisted projection (done once in the wrapper, not per destination tile).
    # TODO(synk): dropout(x) would be applied here in training mode.
    xs = x * norm                                           # source-node scaling
    whT = jnp.einsum('uf,hdfo->hdou', xs, weights.astype(jnp.float32))
    whT = whT.reshape(H, DO, Np).astype(jnp.bfloat16)       # (H, D*O, Np), bf16

    adj_bf16 = adj.astype(jnp.bfloat16)                     # exact for 0/1 entries
    norm_t = norm.reshape(1, Np)

    n_tiles = Np // tile
    # (dst tile, src tile, head): head innermost -> adjacency block reused across heads.
    grid = (n_tiles, n_tiles, H)

    kernel = functools.partial(_geom_gcn_kernel, num_divisions=D, out_feats=O)

    agg_flops = 2 * H * DO * Np * Np
    bytes_accessed = (D * Np * Np * 2               # adjacency, streamed once
                      + n_tiles * H * DO * Np * 2   # whT, re-streamed per dst tile
                      + Np * 4                      # dst norm
                      + Np * H * DO * 4)            # output

    out = pl.pallas_call(
        kernel,
        out_shape=jax.ShapeDtypeStruct((Np, H * DO), jnp.float32),
        grid_spec=pltpu.PrefetchScalarGridSpec(
            num_scalar_prefetch=0,
            grid=grid,
            in_specs=[
                # This head's projected features (transposed), source tile k.
                pl.BlockSpec((1, DO, tile), lambda i, k, h: (h, 0, k)),
                # Adjacency: source rows k, destination columns i, all divisions.
                # Index independent of h -> Pallas skips the re-DMA across heads.
                pl.BlockSpec((D, tile, tile), lambda i, k, h: (0, k, i)),
                # Destination-node norm for this dst tile (constant across k and h).
                pl.BlockSpec((1, tile), lambda i, k, h: (0, i)),
            ],
            # Head-interleaved, lane-dense output block (dst tile, head).
            out_specs=pl.BlockSpec((tile, DO), lambda i, k, h: (i, h)),
            scratch_shapes=[pltpu.VMEM((H, DO, tile), jnp.float32)],
        ),
        compiler_params=pltpu.CompilerParams(
            dimension_semantics=("parallel", "arbitrary", "arbitrary"),
            vmem_limit_bytes=vmem_limit,
        ),
        cost_estimate=pl.CostEstimate(
            flops=agg_flops, transcendentals=0, bytes_accessed=bytes_accessed),
    )(whT, adj_bf16, norm_t)

    return out[:N]


def _reference_forward(x, norm, weights, adj):
    """Pure-JAX f32 reference of the same math for a sanity check."""
    H, D, F, O = weights.shape
    xs = x * norm
    heads = []
    for h in range(H):
        parts = []
        for d in range(D):
            wh = xs @ weights[h, d]              # (N, O)
            parts.append(adj[d].T @ wh)          # h_d[v] = sum_u adj[d,u,v] * Wh_d[u]
        hcat = jnp.concatenate(parts, axis=-1)
        heads.append(jnp.maximum(hcat * norm, 0.0))
    return jnp.concatenate(heads, axis=-1)


if __name__ == "__main__":
    # Small, GeomGCN-consistent shapes. N=200 + tile=128 exercises padding
    # (200 -> 256), K-tiling (n_k=2), the persistent accumulator and the
    # head-interleaved output path.
    N = 200
    in_feats = 32
    out_feats = 32
    num_divisions = 4   # geometric relation subgraphs
    num_heads = 2

    key = jax.random.PRNGKey(0)
    k_x, k_w, k_adj, k_div = jax.random.split(key, 4)

    # Node features.
    x = jax.random.normal(k_x, (N, in_feats), dtype=jnp.float32)

    # Deterministic synthetic graph: sparse random directed edges, each edge
    # assigned to one of `num_divisions` subgraphs.
    edge_prob = jax.random.uniform(k_adj, (N, N))
    has_edge = (edge_prob < 0.15).astype(jnp.float32)
    has_edge = has_edge * (1.0 - jnp.eye(N, dtype=jnp.float32))  # no self loops
    div_assign = jax.random.randint(k_div, (N, N), 0, num_divisions)
    # adj[d, u, v] = 1 iff edge u->v exists and belongs to division d.
    adj = jnp.stack(
        [has_edge * (div_assign == d).astype(jnp.float32) for d in range(num_divisions)],
        axis=0,
    )

    # Per-node norm (as would live in g.ndata['norm']): 1/sqrt(in_degree + 1).
    in_deg = jnp.sum(has_edge, axis=0)
    norm = (1.0 / jnp.sqrt(in_deg + 1.0)).reshape(N, 1).astype(jnp.float32)

    # Xavier-uniform weights for each (head, division) Linear(in_feats, out_feats,
    # bias=False), stored pre-transposed as (F, O) so the projection is x @ W.
    bound = (6.0 / (in_feats + out_feats)) ** 0.5
    weights = jax.random.uniform(
        k_w, (num_heads, num_divisions, in_feats, out_feats),
        minval=-bound, maxval=bound, dtype=jnp.float32,
    )

    out = geom_gcn_forward(x, norm, weights, adj, tile=128)
    out = jax.block_until_ready(out)

    ref = _reference_forward(x, norm, weights, adj)
    assert out.shape == (N, num_heads * num_divisions * out_feats)
    # Wh is bf16 inside the kernel (adjacency 0/1 is exact in bf16, accumulation
    # is f32), so tolerance is loosened slightly vs the pure-f32 reference.
    assert jnp.allclose(out, ref, atol=2e-2, rtol=2e-2)

    print("KERNEL_OK")
</pallas_src>

<mosaic_0001>
module attributes {stable_mosaic.version = 11 : i64} {
  func.func @_geom_gcn_kernel(%arg0: i32, %arg1: i32, %arg2: i32, %arg3: memref<1x128x128xbf16, #tpu.memory_space<vmem>>, %arg4: memref<4x128x128xbf16, #tpu.memory_space<vmem>>, %arg5: memref<1x128xf32, #tpu.memory_space<vmem>>, %arg6: memref<128x128xf32, #tpu.memory_space<vmem>>, %arg7: memref<2x128x128xf32, #tpu.memory_space<vmem>>) attributes {dimension_semantics = [#tpu.dimension_semantics<parallel>, #tpu.dimension_semantics<arbitrary>, #tpu.dimension_semantics<arbitrary>], iteration_bounds = array<i64: 2, 2, 2>, scalar_prefetch = 0 : i64, scratch_operands = 1 : i64, tpu.core_type = #tpu.core_type<tc>, window_params = [{transform_indices = @transform_0, window_bounds = array<i64: 1, 128, 128>}, {transform_indices = @transform_1, window_bounds = array<i64: 4, 128, 128>}, {transform_indices = @transform_2, window_bounds = array<i64: 1, 128>}, {transform_indices = @transform_3, window_bounds = array<i64: 128, 128>}]} {
    %c0_i32 = arith.constant 0 : i32
    %0 = arith.cmpi eq, %arg1, %c0_i32 : i32
    %1 = arith.extui %0 : i1 to i32
    %c0_i32_0 = arith.constant 0 : i32
    %2 = arith.cmpi ne, %1, %c0_i32_0 : i32
    scf.if %2 {
      %cst_26 = arith.constant 0.000000e+00 : f32
      %35 = vector.broadcast %cst_26 : f32 to vector<128x128xf32>
      %36 = arith.index_cast %arg2 : i32 to index
      %c0_27 = arith.constant 0 : index
      %c0_28 = arith.constant 0 : index
      %37 = vector.load %arg7[%36, %c0_27, %c0_28] : memref<2x128x128xf32, #tpu.memory_space<vmem>>, vector<1x128x128xf32>
      %38 = vector.shape_cast %37 : vector<1x128x128xf32> to vector<128x128xf32>
      %39 = vector.shape_cast %35 : vector<128x128xf32> to vector<1x128x128xf32>
      tpu.vector_store %arg7[%36, %c0_27, %c0_28], %39 {strides = array<i32>} : memref<2x128x128xf32, #tpu.memory_space<vmem>>, vector<1x128x128xf32>,
    } else {
    }
    %c0 = arith.constant 0 : index
    %c0_1 = arith.constant 0 : index
    %c0_2 = arith.constant 0 : index
    %3 = vector.load %arg3[%c0, %c0_1, %c0_2] : memref<1x128x128xbf16, #tpu.memory_space<vmem>>, vector<1x32x128xbf16>
    %4 = vector.shape_cast %3 : vector<1x32x128xbf16> to vector<32x128xbf16>
    %c0_3 = arith.constant 0 : index
    %c0_4 = arith.constant 0 : index
    %c0_5 = arith.constant 0 : index
    %5 = vector.load %arg4[%c0_3, %c0_4, %c0_5] : memref<4x128x128xbf16, #tpu.memory_space<vmem>>, vector<1x128x128xbf16>
    %6 = vector.shape_cast %5 : vector<1x128x128xbf16> to vector<128x128xbf16>
    %cst = arith.constant dense<0.000000e+00> : vector<32x128xf32>
    %7 = tpu.matmul %4, %6, %cst {dimension_numbers = #tpu.dot_dimension_numbers<[1], [0], [0], [1], [0, 0, 1, 1], [], []>} : vector<32x128xbf16>, vector<128x128xbf16>, vector<32x128xf32> -> vector<32x128xf32>
    %c0_6 = arith.constant 0 : index
    %c32 = arith.constant 32 : index
    %c0_7 = arith.constant 0 : index
    %8 = vector.load %arg3[%c0_6, %c32, %c0_7] : memref<1x128x128xbf16, #tpu.memory_space<vmem>>, vector<1x32x128xbf16>
    %9 = vector.shape_cast %8 : vector<1x32x128xbf16> to vector<32x128xbf16>
    %c1 = arith.constant 1 : index
    %c0_8 = arith.constant 0 : index
    %c0_9 = arith.constant 0 : index
    %10 = vector.load %arg4[%c1, %c0_8, %c0_9] : memref<4x128x128xbf16, #tpu.memory_space<vmem>>, vector<1x128x128xbf16>
    %11 = vector.shape_cast %10 : vector<1x128x128xbf16> to vector<128x128xbf16>
    %cst_10 = arith.constant dense<0.000000e+00> : vector<32x128xf32>
    %12 = tpu.matmul %9, %11, %cst_10 {dimension_numbers = #tpu.dot_dimension_numbers<[1], [0], [0], [1], [0, 0, 1, 1], [], []>} : vector<32x128xbf16>, vector<128x128xbf16>, vector<32x128xf32> -> vector<32x128xf32>
    %c0_11 = arith.constant 0 : index
    %c64 = arith.constant 64 : index
    %c0_12 = arith.constant 0 : index
    %13 = vector.load %arg3[%c0_11, %c64, %c0_12] : memref<1x128x128xbf16, #tpu.memory_space<vmem>>, vector<1x32x128xbf16>
    %14 = vector.shape_cast %13 : vector<1x32x128xbf16> to vector<32x128xbf16>
    %c2 = arith.constant 2 : index
    %c0_13 = arith.constant 0 : index
    %c0_14 = arith.constant 0 : index
    %15 = vector.load %arg4[%c2, %c0_13, %c0_14] : memref<4x128x128xbf16, #tpu.memory_space<vmem>>, vector<1x128x128xbf16>
    %16 = vector.shape_cast %15 : vector<1x128x128xbf16> to vector<128x128xbf16>
    %cst_15 = arith.constant dense<0.000000e+00> : vector<32x128xf32>
    %17 = tpu.matmul %14, %16, %cst_15 {dimension_numbers = #tpu.dot_dimension_numbers<[1], [0], [0], [1], [0, 0, 1, 1], [], []>} : vector<32x128xbf16>, vector<128x128xbf16>, vector<32x128xf32> -> vector<32x128xf32>
    %c0_16 = arith.constant 0 : index
    %c96 = arith.constant 96 : index
    %c0_17 = arith.constant 0 : index
    %18 = vector.load %arg3[%c0_16, %c96, %c0_17] : memref<1x128x128xbf16, #tpu.memory_space<vmem>>, vector<1x32x128xbf16>
    %19 = vector.shape_cast %18 : vector<1x32x128xbf16> to vector<32x128xbf16>
    %c3 = arith.constant 3 : index
    %c0_18 = arith.constant 0 : index
    %c0_19 = arith.constant 0 : index
    %20 = vector.load %arg4[%c3, %c0_18, %c0_19] : memref<4x128x128xbf16, #tpu.memory_space<vmem>>, vector<1x128x128xbf16>
    %21 = vector.shape_cast %20 : vector<1x128x128xbf16> to vector<128x128xbf16>
    %cst_20 = arith.constant dense<0.000000e+00> : vector<32x128xf32>
    %22 = tpu.matmul %19, %21, %cst_20 {dimension_numbers = #tpu.dot_dimension_numbers<[1], [0], [0], [1], [0, 0, 1, 1], [], []>} : vector<32x128xbf16>, vector<128x128xbf16>, vector<32x128xf32> -> vector<32x128xf32>
    %23 = arith.index_cast %arg2 : i32 to index
    %c0_21 = arith.constant 0 : index
    %c0_22 = arith.constant 0 : index
    %24 = vector.load %arg7[%23, %c0_21, %c0_22] : memref<2x128x128xf32, #tpu.memory_space<vmem>>, vector<1x128x128xf32>
    %25 = vector.shape_cast %24 : vector<1x128x128xf32> to vector<128x128xf32>
    %26 = tpu.concatenate %7, %12, %17, %22 in 0 : vector<32x128xf32>, vector<32x128xf32>, vector<32x128xf32>, vector<32x128xf32> -> vector<128x128xf32>
    %27 = arith.addf %25, %26 : vector<128x128xf32>
    %28 = arith.index_cast %arg2 : i32 to index
    %c0_23 = arith.constant 0 : index
    %c0_24 = arith.constant 0 : index
    %29 = vector.load %arg7[%28, %c0_23, %c0_24] : memref<2x128x128xf32, #tpu.memory_space<vmem>>, vector<1x128x128xf32>
    %30 = vector.shape_cast %29 : vector<1x128x128xf32> to vector<128x128xf32>
    %31 = vector.shape_cast %27 : vector<128x128xf32> to vector<1x128x128xf32>
    tpu.vector_store %arg7[%28, %c0_23, %c0_24], %31 {strides = array<i32>} : memref<2x128x128xf32, #tpu.memory_space<vmem>>, vector<1x128x128xf32>,
    %c1_i32 = arith.constant 1 : i32
    %32 = arith.cmpi eq, %arg1, %c1_i32 : i32
    %33 = arith.extui %32 : i1 to i32
    %c0_i32_25 = arith.constant 0 : i32
    %34 = arith.cmpi ne, %33, %c0_i32_25 : i32
    scf.if %34 {
      %35 = arith.index_cast %arg2 : i32 to index
      %c0_26 = arith.constant 0 : index
      %c0_27 = arith.constant 0 : index
      %36 = vector.load %arg7[%35, %c0_26, %c0_27] : memref<2x128x128xf32, #tpu.memory_space<vmem>>, vector<1x128x128xf32>
      %37 = vector.shape_cast %36 : vector<1x128x128xf32> to vector<128x128xf32>
      %c0_28 = arith.constant 0 : index
      %c0_29 = arith.constant 0 : index
      %38 = vector.load %arg5[%c0_28, %c0_29] : memref<1x128xf32, #tpu.memory_space<vmem>>, vector<1x128xf32>
      %39 = vector.broadcast %38 : vector<1x128xf32> to vector<128x128xf32>
      %40 = arith.mulf %37, %39 : vector<128x128xf32>
      %cst_30 = arith.constant 0.000000e+00 : f32
      %41 = vector.broadcast %cst_30 : f32 to vector<128x128xf32>
      %42 = arith.maximumf %40, %41 : vector<128x128xf32>
      %43 = tpu.transpose %42, [1, 0] : vector<128x128xf32> -> vector<128x128xf32>
      %c0_31 = arith.constant 0 : index
      %c0_32 = arith.constant 0 : index
      %44 = vector.load %arg6[%c0_31, %c0_32] : memref<128x128xf32, #tpu.memory_space<vmem>>, vector<128x128xf32>
      tpu.vector_store %arg6[%c0_31, %c0_32], %43 {strides = array<i32>} : memref<128x128xf32, #tpu.memory_space<vmem>>, vector<128x128xf32>,
    } else {
    }
    return
  }
  func.func @transform_0(%arg0: i32, %arg1: i32, %arg2: i32) -> (i32, i32, i32) {
    %c0_i32 = arith.constant 0 : i32
    %c0_i32_0 = arith.constant 0 : i32
    return %arg2, %c0_i32, %arg1 : i32, i32, i32
  }
  func.func @transform_1(%arg0: i32, %arg1: i32, %arg2: i32) -> (i32, i32, i32) {
    %c0_i32 = arith.constant 0 : i32
    %c0_i32_0 = arith.constant 0 : i32
    return %c0_i32, %arg1, %arg0 : i32, i32, i32
  }
  func.func @transform_2(%arg0: i32, %arg1: i32, %arg2: i32) -> (i32, i32) {
    %c0_i32 = arith.constant 0 : i32
    %c0_i32_0 = arith.constant 0 : i32
    return %c0_i32, %arg0 : i32, i32
  }
  func.func @transform_3(%arg0: i32, %arg1: i32, %arg2: i32) -> (i32, i32) {
    %c0_i32 = arith.constant 0 : i32
    return %arg0, %arg2 : i32, i32
  }
}

</mosaic_0001>

<bundles_post_ra>
// kernel: tpu_custom_call.1
= control target key start
LH: loop header
LB: loop body
LE: loop exit
PB: predicated region body
PF: predicated region fallthrough
CT: control target
= control target key end

     0   :  { %s2454_s0 = inlined_call_operand.hbm [shape: bf16[2,128,256], index: 0, kind: input, shape index: {}]   ;;  %s2455_s1 = inlined_call_operand.hbm [shape: bf16[4,256,256], index: 1, kind: input, shape index: {}]   ;;  %s2456_s2 = inlined_call_operand.hbm [shape: f32[1,256], index: 2, kind: input, shape index: {}]   ;;  %s2457_s3 = inlined_call_operand.hbm [shape: f32[256,256], index: 3, kind: output, shape index: {}]  }
   0x1   :  { %2476 = sst [smem:[#allocation34_spill]] %s2454_s0 }
   0x2   :  { %2477 = sst [smem:[#allocation35_spill]] %s2457_s3 }
   0x3   :  { %8 = vsyncpa [#allocation4], 0 }
   0x4   :  { %10 = vsyncpa [#allocation4 + $0x1], 0 }
   0x5   :  { %11 = vsyncpa [#allocation7], 0 }
   0x6   :  { %13 = vsyncpa [#allocation7 + $0x1], 0 }
   0x7   :  { %14 = vsyncpa [#allocation5], 0 }
   0x8   :  { %16 = vsyncpa [#allocation5 + $0x1], 0  ;;  %s1924_s12 = smov 0   ;;  %s1926_s13 = smov 0  }
   0x9   :  { %s1928_s14 = smov 0   ;;  %s1930_s15 = smov 0  }
   0xa   :  { %s1932_s16 = smov 0   ;;  %s1934_s17 = smov 0  }
   0xb   :  { %s1936_s18 = smov 0   ;;  %s1938_s19 = smov 0  }
   0xc   :  { %s1940_s20 = smov 0   ;;  %s1942_s21 = smov 0  }
   0xd   :  { %s1944_s22 = smov 0   ;;  %s1946_s23 = smov 0  }
   0xe   :  { %s1948_s24 = smov 0   ;;  %s1950_s25 = smov 0  }
   0xf   :  { %s1952_s26 = smov 0   ;;  %s1954_s27 = smov 0  }
  0x10   :  { %s1956_s28 = smov 0   ;;  %s1958_s29 = smov 0  }
  0x11   :  { %s1960_s30 = smov 0  }
  0x12 LB: > { %2478 = sst [smem:[#allocation17_spill]] %s1813_s12  ;;  %s2020_s4 = sadd.s32 4294967295, %s1885_s30   ;;  %s1885_s30 = sphi %s1960_s30, %s22_s30   ;;  %s1881_s29 = sphi %s1958_s29, %s2546_s29   ;;  %s1877_s28 = sphi %s1956_s28, %s2545_s28   ;;  %s1873_s27 = sphi %s1954_s27, %s2530_s27   ;;  %s1869_s26 = sphi %s1952_s26, %s2544_s26   ;;  %s1865_s25 = sphi %s1950_s25, %s2543_s25   ;;  %s1861_s24 = sphi %s1948_s24, %s2529_s24   ;;  %s1857_s23 = sphi %s1946_s23, %s2528_s23   ;;  %s1853_s22 = sphi %s1944_s22, %s2542_s22   ;;  %s1849_s21 = sphi %s1942_s21, %s2541_s21   ;;  %s1845_s20 = sphi %s1940_s20, %s2540_s20   ;;  %s1841_s19 = sphi %s1938_s19, %s2539_s19   ;;  %s1837_s18 = sphi %s1936_s18, %s2538_s18   ;;  %s1833_s17 = sphi %s1934_s17, %s2537_s17   ;;  %s1829_s16 = sphi %s1932_s16, %s2536_s16   ;;  %s1825_s15 = sphi %s1930_s15, %s2535_s15   ;;  %s1821_s14 = sphi %s1928_s14, %s2524_s14   ;;  %s1817_s13 = sphi %s1926_s13, %s2533_s13   ;;  %s1813_s12 = sphi %s1924_s12, %s2531_s12  }
  0x13   : > { %2479 = sst [smem:[#allocation18_spill]] %s1821_s14  ;;  %s34_s6 = sadd.s32 1, %s1873_s27 }
  0x14   : > { %2480 = sst [smem:[#allocation19_spill]] %s1857_s23  ;;  %s37_s7 = sadd.s32 1, %s1877_s28 }
  0x15   : > { %2481 = sst [smem:[#allocation20_spill]] %s1861_s24  ;;  %p35_p0 = scmp.ge.s32.totalorder %s34_s6, 2 }
  0x16   : > { %2482 = sst [smem:[#allocation21_spill]] %s1865_s25  ;;  %s41_s8 = sadd.s32 1, %s1881_s29 }
  0x17   : > { %2483 = sst [smem:[#allocation22_spill]] %s1869_s26  ;;  %s50_s9 = sadd.s32 1, %s1857_s23 }
  0x18   : > { %2484 = sst [smem:[#allocation23_spill]] %s1873_s27  ;;  %p57_p1 = scmp.ne.s32.totalorder %s1857_s23, %s1853_s22 }
  0x19   : > { %s2548_s6 = smov (%p35_p0, %s34_s6), 0  ;;  %s2550_s7 = smov (!%p35_p0, %s37_s7), %s1877_s28 }
  0x1a   : > { %2485 = sst [smem:[#allocation24_spill]] %s2548_s6  ;;  %s2034_s10 = ssub.s32 %s1873_s27, %s2548_s6 }
  0x1b   : > { %p58_p2 = scmp.eq.s32.totalorder %s1885_s30, 0  ;;  %p39_p3 = scmp.ge.s32.totalorder %s2550_s7, 2 }
  0x1c   : > { %p63_p4 = scmp.ne.s32.totalorder %s1853_s22, %s1849_s21  ;;  %p64_p6 = scmp.eq.s32.totalorder %s2020_s4, 0 }
  0x1d   : > { %p2041_p5 = por %p58_p2, %p57_p1  ;;  %s2552_s7 = smov (%p39_p3, %s2550_s7), 0 }
  0x1e   : > { %2487 = sst [smem:[#allocation25_spill]] %s2552_s7  ;;  %s2554_s8 = smov (!%p39_p3, %s41_s8), %s1881_s29 }
  0x1f   : > { %s46_s5 = ssub.s32 %s1877_s28, %s2552_s7  ;;  %p2053_p7 = por %p64_p6, %p63_p4 }
  0x20   : > { %p43_p8 = scmp.ge.s32.totalorder %s2554_s8, 2  ;;  %s47_s21 = sor.u32 %s46_s5, %s2034_s10 }
  0x21   : > { %s2488_s6 = scalar_select %p2053_p7, 1, 0 }
  0x22   : > { %p48_p9 = scmp.eq.s32.totalorder %s47_s21, 0  ;;  %s78_s3 = sadd.s32 1, %s1845_s20 }
  0x23   : > { %s2556_s8 = smov (%p43_p8, %s2554_s8), 0  ;;  %p85_p10 = scmp.ne.s32.totalorder %s1845_s20, %s1841_s19 }
  0x24   : > { %2489 = sst [smem:[#allocation26_spill]] %s2556_s8  ;;  %s74_s26 = ssub.s32 %s1881_s29, %s2556_s8 }
  0x25   : > { %s2062_s7 = scalar_select %p48_p9, %s1857_s23, %s50_s9  }
  0x26   : > { %s75_s24 = sor.u32 %s74_s26, %s46_s5  ;;  %p91_p11 = scmp.ne.s32.totalorder %s1841_s19, %s1837_s18 }
  0x27   : > { %2490 = sst [smem:[#allocation27_spill]] %s2062_s7  ;;  %p76_p12 = scmp.eq.s32.totalorder %s75_s24, 0 }
  0x28   : > { %p2072_p13 = por %p85_p10, %p58_p2  ;;  %p2078_p0 = por %p91_p11, %p64_p6 }
  0x29   : > { %p102_p1 = scmp.eq.s32.totalorder %s74_s26, 0  ;;  %s104_s18 = sadd.s32 1, %s1833_s17 }
  0x2a   : > { %s2492_s9 = scalar_select %p2078_p0, 1, 0 }
  0x2b   : > { %s2083_s5 = scalar_select %p76_p12, %s1845_s20, %s78_s3  }
  0x2c   : > { %2493 = sst [smem:[#allocation28_spill]] %s2492_s9  ;;  %p111_p3 = scmp.ne.s32.totalorder %s1833_s17, %s1829_s16 }
  0x2d   : > { %2494 = sst [smem:[#allocation29_spill]] %s2083_s5  ;;  %p117_p8 = scmp.ne.s32.totalorder %s1829_s16, %s1825_s15 }
  0x2e   : > { %s2089_s24 = scalar_select %p102_p1, %s1833_s17, %s104_s18  }
  0x2f   : > { %p2093_p4 = por %p111_p3, %p58_p2  ;;  %s129_s7 = sor.u32 %s74_s26, %s2034_s10 }
  0x30   : > { %2495 = sst [smem:[#allocation30_spill]] %s2089_s24  ;;  %s132_s25 = sadd.s32 1, %s1821_s14 }
  0x31   : > { %s2496_s8 = scalar_select %p2093_p4, 1, 0 }
  0x32   : > { %p2103_p9 = por %p117_p8, %p64_p6  ;;  %p130_p10 = scmp.eq.s32.totalorder %s129_s7, 0 }
  0x33   : > { %p142_p11 = scmp.ne.s32.totalorder %s1821_s14, %s1817_s13  ;;  %p143_p12 = scmp.eq.s32.totalorder %s2020_s4, 7 }
  0x34   : > { %s2497_s9 = scalar_select %p2103_p9, 1, 0 }
  0x35   : > { %s2111_s3 = scalar_select %p130_p10, %s1821_s14, %s132_s25  }
  0x36   : > { %p2113_p1 = por %p143_p12, %p142_p11  ;;  %p148_p2 = scmp.ne.s32.totalorder %s1817_s13, %s1813_s12 }
  0x37   : > { %2498 = sst [smem:[#allocation31_spill]] %s2111_s3  ;;  %s2501_s5 = sadd.s32 4294967294, %s1885_s30  }
  0x38   : > { %s2499_s18 = scalar_select %p2113_p1, 1, 0 }
  0x39   : > { %p149_p3 = scmp.eq.s32.totalorder %s2501_s5, 7  ;;  %p1173_p6 = scmp.ge.s32.totalorder %s1885_s30, 8 }
  0x3a   : > { %2500 = sst [smem:[#allocation32_spill]] %s2499_s18  ;;  %s169_s25 = sand.u32 (!%p1173_p6), 1, %s1857_s23  }
  0x3b   : > { %p2121_p0 = por %p149_p3, %p148_p2  ;;  %165 = sbr.rel (%p1173_p6) target bundleno = 134 (0x86), region = 16 }
  0x3c   : > { %s1175_s26 = sshll.u32 (!%p1173_p6), %s1873_s27, 5  ;;  %s1174_s7 = sshll.u32 (!%p1173_p6), %s169_s25, 6 }
  0x3d   : > { %s2502_s15 = scalar_select %p2121_p0, 1, 0 }
  0x3e   : > { %s178_s10 = sadd.s32 (!%p1173_p6), %s1877_s28, %s1175_s26  ;;  %s173_s3 = scalar_lea.vmem (!%p1173_p6), [#allocation3], %s1174_s7 }
  0x3f   : > { %2503 = sst [smem:[#allocation33_spill]] %s2502_s15  ;;  %s1176_s24 = sshll.u32 (!%p1173_p6), %s178_s10, 6 }
  0x40   : > { %s181_s14 = sshll.u32 (!%p1173_p6), %s173_s3, 4  ;;  %s2504_s0 = sld [smem:[#allocation34_spill]] (!%p1173_p6)  ;;  %s2134_s14 = int_to_ptr.vmem [resolvable:$true] %s181_s14 }
  0x41   : > { %s2136_s15 = scalar_lea.sflag (!%p1173_p6), [#allocation4], %s169_s25 }
  0x46   : > { %s2132_s18 = scalar_lea.hbm %s2504_s0, %s1176_s24  ;;  %s1639_s7 = scalar_lea.hbm %s2504_s0, 4096 }
  0x47   : > { %s1635_s23 = scalar_lea.hbm %s2132_s18, 1024  ;;  %p1640_p12 = scmp.lt.u32.totalorder %s2132_s18, %s2504_s0 }
  0x48   : > { %p1636_p8 = scmp.ne.s32.totalorder %s2132_s18, %s1635_s23  ;;  %p1641_p2 = scmp.lt.u32.totalorder %s1639_s7, %s1635_s23 }
  0x49   : > { %p1643_p6 = scmp.lt.u32.totalorder %s1635_s23, %s2132_s18 }
  0x4a   : > { %p1637_p10 = pnand %p1636_p8, %p2041_p5  ;;  %p1642_p3 = por %p1641_p2, %p1640_p12 }
  0x4c   : > { %p1638_p11 = pneg %p1637_p10  ;;  %p1644_p0 = por %p1643_p6, %p1642_p3 }
  0x4e   : > { %p1645_p1 = pnand %p1644_p0, %p1638_p11 }
  0x50   : > { %1648 = shalt.err (!%p1645_p1)
}
  0x51   : > { %s1649_s25 = scalar_lea.vmem %s2134_s14, 1024  ;;  %s1887_s10 = smov [#allocation3]  }
  0x52   : > { %p1650_p8 = scmp.ne.s32.totalorder %s2134_s14, %s1649_s25  ;;  %s1653_s5 = sshll.u32 %s1887_s10, 4  ;;  %s1654_s5 = int_to_ptr.vmem [resolvable:$false] %s1653_s5 }
  0x53   : > { %s1655_s26 = scalar_lea.vmem %s1654_s5, 2048  ;;  %p1656_p7 = scmp.lt.s32.totalorder %s2134_s14, %s1654_s5 }
  0x54   : > { %p1651_p10 = pnand %p1650_p8, %p2041_p5  ;;  %p1657_p4 = scmp.lt.s32.totalorder %s1655_s26, %s1649_s25 }
  0x56   : > { %p1652_p9 = pneg %p1651_p10  ;;  %p1658_p12 = por %p1657_p4, %p1656_p7 }
  0x58   : > { %p1659_p2 = pnand %p1658_p12, %p1652_p9 }
  0x5a   : > { %1662 = shalt.err (!%p1659_p2)
}
  0x5b   : > { %s1888_s23 = smov 128   ;;  %s1889_s3 = smov 64  }
  0x5c   : > { %s1890_s7 = smov 4  }
  0x5d   : > { %1409 = dma.hbm_to_vmem [thread:$0]  (%p2041_p5), %s2132_s18, 1024, %s2134_s14, %s2136_s15, %s1888_s23, %s1889_s3, %s1890_s7  }
  0x5e   : > { %s193_s12 = sand.u32 1, %s1845_s20   ;;  %s191_s24 = sand.u32 1, %s1885_s30  }
  0x5f   : > { %s1177_s25 = sshll.u32 %s193_s12, 8  ;;  %s1287_s10 = sshll.u32 %s1877_s28, 5 }
  0x60   : > { %s201_s5 = sadd.s32 %s1881_s29, %s1287_s10  ;;  %s195_s26 = scalar_lea.vmem [#allocation6], %s1177_s25 }
  0x61   : > { %s216_s0 = sshll.u32 %s195_s26, 4  ;;  %s1180_s27 = sshll.u32 %s201_s5, 6  ;;  %s217_s0 = int_to_ptr.vmem [resolvable:$true] %s216_s0 }
  0x62   : > { %s1410_s14 = scalar_select %p2072_p13, [#allocation0], [#allocation12] }
  0x63   : > { %s1891_s11 = smov 4096   ;;  %s1892_s15 = smov 1024  }
  0x64   : > { %1411 = sst [smem:[#allocation11]] (%p2072_p13), %s1891_s11  ;;  %s1893_s23 = smov 16  }
  0x65   : > { %s208_s18 = sld [smem:[%s1410_s14]]   ;;  %s1894_s3 = smov 128  }
  0x66   : > { %1412 = sst [smem:[#allocation11 + $0x1]] (%p2072_p13), %s1892_s15  ;;  %s203_s25 = scalar_lea.hbm %s2455_s1, %s1180_s27 }
  0x67   : > { %1413 = sst [smem:[#allocation11 + $0x2]] (%p2072_p13), %s1893_s23  ;;  %s1895_s10 = smov 64  }
  0x68   : > { %1414 = sst [smem:[#allocation11 + $0x3]] (%p2072_p13), %s1894_s3  ;;  %s1896_s5 = smov 4  }
  0x69   : > { %1415 = sst [smem:[#allocation11 + $0x4]] (%p2072_p13), %s1895_s10  ;;  %s2181_s11 = scalar_lea.sflag [#allocation7], %s191_s24 }
  0x6a   : > { %1416 = sst [smem:[#allocation11 + $0x5]] (%p2072_p13), %s1896_s5  ;;  %s1897_s15 = smov [#allocation10]  }
  0x6b   : > { %s1181_s26 = sshll.u32 %s208_s18, 26  ;;  %s241_s23 = sand.u32 1, %s1833_s17  }
  0x6c   : > { %s1182_s14 = sadd.s32 134217728, %s1181_s26  ;;  %s1183_s3 = sshll.u32 %s1881_s29, 4 }
  0x6d   : > { %1417 = dma.general (%p2072_p13), %s203_s25, 4096, %s217_s0, %s2181_s11, %s1897_s15, [#allocation11], %s1182_s14, 0  }
  0x6e   : > { %s2191_s12 = scalar_lea.hbm %s2456_s2, %s1183_s3  ;;  %s242_s24 = scalar_lea.vmem [#allocation8], %s241_s23 }
  0x6f   : > { %s249_s18 = sshll.u32 %s242_s24, 4  ;;  %s1663_s10 = scalar_lea.hbm %s2191_s12, 16  ;;  %s250_s18 = int_to_ptr.vmem [resolvable:$true] %s249_s18 }
  0x70   : > { %p1664_p5 = scmp.ne.s32.totalorder %s2191_s12, %s1663_s10  ;;  %p2505_p7 = scmp.ne.s32.totalorder %s2496_s8, 0 }
  0x71   : > { %s1667_s25 = scalar_lea.hbm %s2456_s2, 32  ;;  %p1668_p4 = scmp.lt.u32.totalorder %s2191_s12, %s2456_s2 }
  0x72   : > { %p1665_p13 = pnand %p1664_p5, %p2505_p7  ;;  %p1669_p9 = scmp.lt.u32.totalorder %s1667_s25, %s1663_s10 }
  0x73   : > { %p1671_p11 = scmp.lt.u32.totalorder %s1663_s10, %s2191_s12 }
  0x74   : > { %p1666_p0 = pneg %p1665_p13  ;;  %p1670_p1 = por %p1669_p9, %p1668_p4 }
  0x76   : > { %p1672_p3 = por %p1671_p11, %p1670_p1 }
  0x78   : > { %p1673_p6 = pnand %p1672_p3, %p1666_p0 }
  0x7a   : > { %1676 = shalt.err (!%p1673_p6)
}
  0x7b   : > { %s1677_s14 = scalar_lea.vmem %s250_s18, 16  ;;  %s1898_s15 = smov [#allocation8]  }
  0x7c   : > { %p1678_p8 = scmp.ne.s32.totalorder %s250_s18, %s1677_s14  ;;  %s1681_s23 = sshll.u32 %s1898_s15, 4  ;;  %s1682_s23 = int_to_ptr.vmem [resolvable:$false] %s1681_s23 }
  0x7d   : > { %s1683_s3 = scalar_lea.vmem %s1682_s23, 32  ;;  %p1684_p2 = scmp.lt.s32.totalorder %s250_s18, %s1682_s23 }
  0x7e   : > { %p1679_p10 = pnand %p1678_p8, %p2505_p7  ;;  %p1685_p5 = scmp.lt.s32.totalorder %s1683_s3, %s1677_s14 }
  0x80   : > { %p1680_p12 = pneg %p1679_p10  ;;  %p1686_p13 = por %p1685_p5, %p1684_p2 }
  0x82   : > { %p1687_p4 = pnand %p1686_p13, %p1680_p12 }
  0x84   : > { %1690 = shalt.err (!%p1687_p4)
}
  0x85   : > { %1418 = dma.hbm_to_vmem [thread:$0]  (%p2505_p7), %s2191_s12, 16, %s250_s18, %s2181_s11  }
  0x86 PF: > { %p1184_p0 = scmp.ge.s32.totalorder %s1885_s30, 1  ;;  %p254_p9 = scmp.lt.s32.totalorder %s1885_s30, 9 }
  0x88   : > { %p255_p1 = pnand %p1184_p0, %p254_p9 }
  0x89   : > { %s260_s27 = sand.u32 (!%p255_p1), 1, %s1853_s22   ;;  %p2506_p11 = scmp.ne.s32.totalorder (!%p255_p1), %s2488_s6, 0 }
  0x8a   : > { %258 = sbr.rel (%p255_p1) target bundleno = 661 (0x295), region = 32  ;;  %s1185_s7 = sshll.u32 (!%p255_p1), %s260_s27, 6 }
  0x8b   : > { %s261_s24 = scalar_lea.sflag (!%p255_p1), [#allocation4], %s260_s27  ;;  %s2214_s10 = scalar_lea.vmem (!%p255_p1), [#allocation3], %s1185_s7 }
  0x91   : > { %1796 = dma.done.wait (%p2506_p11), %s261_s24, 1024  }
  0x92   : > { %1798 = vsyncadd (%p2506_p11), %s261_s24, 4294966272  ;;  %s2507_s8 = sld [smem:[#allocation28_spill]]  ;;  %s269_s11 = sand.u32 1, %s2020_s4  }
  0x93   : > { %s271_s12 = sand.u32 1, %s1841_s19   ;;  %s270_s0 = scalar_lea.sflag [#allocation7], %s269_s11 }
  0x94   : > { %s1186_s18 = sshll.u32 %s271_s12, 8 }
  0x95   : > { %s2222_s21 = scalar_lea.vmem [#allocation6], %s1186_s18 }
  0x98   : > { %p2508_p7 = scmp.ne.s32.totalorder %s2507_s8, 0 }
  0x9a   : > { %1800 = dma.done.wait (%p2508_p7), %s270_s0, 4096  }
  0x9b   : > { %1802 = vsyncadd (%p2508_p7), %s270_s0, 4294963200  ;;  %s280_s25 = sand.u32 1, %s1829_s16   ;;  %p2509_p3 = scmp.ne.s32.totalorder %s2497_s9, 0 }
  0x9c   : > { %s2229_s5 = scalar_lea.vmem [#allocation8], %s280_s25 }
  0x9d   : > { %1804 = dma.done.wait (%p2509_p3), %s270_s0, 16  }
  0x9e   : > { %1806 = vsyncadd (%p2509_p3), %s270_s0, 4294967280  ;;  %s310_s4 = sand.u32 1, %s1817_s13   ;;  %s2510_s14 = sld [smem:[#allocation21_spill]] }
  0x9f   : > { %s1187_s6 = sshll.u32 %s310_s4, 7 }
  0xa0   : > { %s2238_s26 = scalar_lea.vmem [#allocation9], %s1187_s6 }
  0xa4   : > { %p1188_p6 = scmp.ne.s32.totalorder %s2510_s14, 0 }
  0xa5   : > { %s2511_s15 = sld [smem:[#allocation20_spill]] (!%p1188_p6)  ;;  %v1899_v0 = vmov (!%p1188_p6), 0.0  }
  0xa6   : > { %319 = sbr.rel (%p1188_p6) target bundleno = 181 (0xb5), region = 48 }
  0xab   : > { %s1189_s23 = sshll.u32 (!%p1188_p6), %s2511_s15, 7 }
  0xac   : > { %s321_s3 = scalar_lea.vmem (!%p1188_p6), [#allocation2], %s1189_s23 }
  0xad   : > { %322 = vst [vmem:[%s321_s3] sm:$0xff] %v1899_v0  ;;  %323 = vst [vmem:[%s321_s3 + $0x8] sm:$0xff] %v1899_v0 }
  0xae   : > { %324 = vst [vmem:[%s321_s3 + $0x10] sm:$0xff] %v1899_v0  ;;  %325 = vst [vmem:[%s321_s3 + $0x18] sm:$0xff] %v1899_v0 }
  0xaf   : > { %326 = vst [vmem:[%s321_s3 + $0x20] sm:$0xff] %v1899_v0  ;;  %327 = vst [vmem:[%s321_s3 + $0x28] sm:$0xff] %v1899_v0 }
  0xb0   : > { %328 = vst [vmem:[%s321_s3 + $0x30] sm:$0xff] %v1899_v0  ;;  %329 = vst [vmem:[%s321_s3 + $0x38] sm:$0xff] %v1899_v0 }
  0xb1   : > { %330 = vst [vmem:[%s321_s3 + $0x40] sm:$0xff] %v1899_v0  ;;  %331 = vst [vmem:[%s321_s3 + $0x48] sm:$0xff] %v1899_v0 }
  0xb2   : > { %332 = vst [vmem:[%s321_s3 + $0x50] sm:$0xff] %v1899_v0  ;;  %333 = vst [vmem:[%s321_s3 + $0x58] sm:$0xff] %v1899_v0 }
  0xb3   : > { %334 = vst [vmem:[%s321_s3 + $0x60] sm:$0xff] %v1899_v0  ;;  %335 = vst [vmem:[%s321_s3 + $0x68] sm:$0xff] %v1899_v0 }
  0xb4   : > { %336 = vst [vmem:[%s321_s3 + $0x70] sm:$0xff] %v1899_v0  ;;  %337 = vst [vmem:[%s321_s3 + $0x78] sm:$0xff] %v1899_v0 }
  0xb5 PF: > { %v1595_v1 = vld [vmem:[%s2222_s21] sm:$0xff]   ;;  %v1597_v3 = vld [vmem:[%s2222_s21 + $0x8] sm:$0xff]   ;;  %v1599_v5 = vld [vmem:[%s2222_s21 + $0x10] sm:$0xff]   ;;  %s2512_s9 = sld [smem:[#allocation20_spill]]  ;;  %s2513_s24 = sld [smem:[#allocation21_spill]] }
  0xb6   : > { %v1596_v2 = vld [vmem:[%s2222_s21 + $0x40] sm:$0xff]   ;;  %1329 = vmatprep.subr.bf16.mxu0 %v1595_v1  ;;  %v1598_v4 = vld [vmem:[%s2222_s21 + $0x48] sm:$0xff]   ;;  %v1600_v6 = vld [vmem:[%s2222_s21 + $0x50] sm:$0xff]  }
  0xb7   : > { %1349 = vmatprep.subr.bf16.mxu1 %v1596_v2  ;;  %1330 = vmatpush3.bf16.msra.mxu0 %v1595_v1  ;;  %v1601_v7 = vld [vmem:[%s2222_s21 + $0x18] sm:$0xff]   ;;  %v1603_v9 = vld [vmem:[%s2222_s21 + $0x20] sm:$0xff]   ;;  %v1605_v11 = vld [vmem:[%s2222_s21 + $0x28] sm:$0xff]  }
  0xb8   : > { %1350 = vmatpush3.bf16.msra.mxu1 %v1596_v2  ;;  %1331 = vmatprep.subr.bf16.mxu0 %v1597_v3  ;;  %v1602_v8 = vld [vmem:[%s2222_s21 + $0x58] sm:$0xff]   ;;  %v1604_v10 = vld [vmem:[%s2222_s21 + $0x60] sm:$0xff]   ;;  %v1606_v12 = vld [vmem:[%s2222_s21 + $0x68] sm:$0xff]  }
  0xb9   : > { %1351 = vmatprep.subr.bf16.mxu1 %v1598_v4  ;;  %v1611_v13 = vld [vmem:[%s2214_s10] sm:$0xff]   ;;  %v1612_v14 = vld [vmem:[%s2214_s10 + $0x10] sm:$0xff]   ;;  %v1609_v17 = vld [vmem:[%s2222_s21 + $0x38] sm:$0xff]  }
  0xba   : > { %1345 = vmatprep.mubr.bf16.mxu0 %v1611_v13  ;;  %1365 = vmatprep.mubr.bf16.mxu1 %v1612_v14  ;;  %v1607_v15 = vld [vmem:[%s2222_s21 + $0x30] sm:$0xff]   ;;  %v1610_v18 = vld [vmem:[%s2222_s21 + $0x78] sm:$0xff]   ;;  %v1615_v19 = vld [vmem:[%s2222_s21 + $0x80] sm:$0xff]  }
  0xbb   : > { %1332 = vmatpush3.bf16.msra.mxu0 %v1597_v3  ;;  %v1608_v16 = vld [vmem:[%s2222_s21 + $0x70] sm:$0xff]   ;;  %v1616_v20 = vld [vmem:[%s2222_s21 + $0xc0] sm:$0xff]   ;;  %v1613_v21 = vld [vmem:[%s2214_s10 + $0x8] sm:$0xff]   ;;  %s1278_s27 = sshll.u32 %s2512_s9, 7  ;;  %p1279_p8 = scmp.ne.s32.totalorder %s2513_s24, 1 }
  0xbc   : > { %1352 = vmatpush3.bf16.msra.mxu1 %v1598_v4  ;;  %1333 = vmatprep.subr.bf16.mxu0 %v1599_v5  ;;  %v1614_v22 = vld [vmem:[%s2214_s10 + $0x18] sm:$0xff]   ;;  %v1617_v23 = vld [vmem:[%s2222_s21 + $0x88] sm:$0xff]   ;;  %v1619_v25 = vld [vmem:[%s2222_s21 + $0x90] sm:$0xff]   ;;  %s2283_s7 = scalar_lea.vmem [#allocation2], %s1278_s27 }
  0xbd   : > { %1353 = vmatprep.subr.bf16.mxu1 %v1600_v6  ;;  %v1618_v24 = vld [vmem:[%s2222_s21 + $0xc8] sm:$0xff]   ;;  %v1620_v26 = vld [vmem:[%s2222_s21 + $0xd0] sm:$0xff]   ;;  %v1631_v27 = vld [vmem:[%s2214_s10 + $0x20] sm:$0xff]  }
  0xbe   : > { %v1632_v28 = vld [vmem:[%s2214_s10 + $0x30] sm:$0xff]   ;;  %v1621_v29 = vld [vmem:[%s2222_s21 + $0x98] sm:$0xff]   ;;  %v1623_v31 = vld [vmem:[%s2222_s21 + $0xa0] sm:$0xff]  }
  0xbf   : > { %1334 = vmatpush3.bf16.msra.mxu0 %v1599_v5  ;;  %v1622_v30 = vld [vmem:[%s2222_s21 + $0xd8] sm:$0xff]   ;;  %v1624_v32 = vld [vmem:[%s2222_s21 + $0xe0] sm:$0xff]   ;;  %v1625_v33 = vld [vmem:[%s2222_s21 + $0xa8] sm:$0xff]  }
  0xc0   : > { %1354 = vmatpush3.bf16.msra.mxu1 %v1600_v6  ;;  %1335 = vmatprep.subr.bf16.mxu0 %v1601_v7  ;;  %v1626_v34 = vld [vmem:[%s2222_s21 + $0xe8] sm:$0xff]   ;;  %v1627_v35 = vld [vmem:[%s2222_s21 + $0xb0] sm:$0xff]   ;;  %v1629_v37 = vld [vmem:[%s2222_s21 + $0xb8] sm:$0xff]  }
  0xc1   : > { %1355 = vmatprep.subr.bf16.mxu1 %v1602_v8  ;;  %v1628_v36 = vld [vmem:[%s2222_s21 + $0xf0] sm:$0xff]   ;;  %v1630_v38 = vld [vmem:[%s2222_s21 + $0xf8] sm:$0xff]   ;;  %v1633_v39 = vld [vmem:[%s2214_s10 + $0x28] sm:$0xff]  }
  0xc2   : > { %v1634_v40 = vld [vmem:[%s2214_s10 + $0x38] sm:$0xff]   ;;  %v861_v41 = vld [vmem:[%s2283_s7 + $0x10] sm:$0xff]  ;;  %v859_v43 = vld [vmem:[%s2283_s7] sm:$0xff] }
  0xc3   : > { %1336 = vmatpush3.bf16.msra.mxu0 %v1601_v7  ;;  %v865_v42 = vld [vmem:[%s2283_s7 + $0x30] sm:$0xff]  ;;  %v863_v45 = vld [vmem:[%s2283_s7 + $0x20] sm:$0xff]  ;;  %v862_v46 = vld [vmem:[%s2283_s7 + $0x18] sm:$0xff] }
  0xc4   : > { %1356 = vmatpush3.bf16.msra.mxu1 %v1602_v8  ;;  %1337 = vmatprep.subr.bf16.mxu0 %v1603_v9  ;;  %v866_v50 = vld [vmem:[%s2283_s7 + $0x38] sm:$0xff]  ;;  %v860_v51 = vld [vmem:[%s2283_s7 + $0x8] sm:$0xff]  ;;  %v869_v1 = vld [vmem:[%s2283_s7 + $0x50] sm:$0xff] }
  0xc5   : > { %1357 = vmatprep.subr.bf16.mxu1 %v1604_v10  ;;  %v864_v56 = vld [vmem:[%s2283_s7 + $0x28] sm:$0xff]  ;;  %v873_v2 = vld [vmem:[%s2283_s7 + $0x70] sm:$0xff]  ;;  %v867_v3 = vld [vmem:[%s2283_s7 + $0x40] sm:$0xff] }
  0xc6   : > { %v871_v5 = vld [vmem:[%s2283_s7 + $0x60] sm:$0xff]  ;;  %v870_v6 = vld [vmem:[%s2283_s7 + $0x58] sm:$0xff] }
  0xc7   : > { %1338 = vmatpush3.bf16.msra.mxu0 %v1603_v9 }
  0xc8   : > { %1358 = vmatpush3.bf16.msra.mxu1 %v1604_v10  ;;  %1339 = vmatprep.subr.bf16.mxu0 %v1605_v11  ;;  %v874_v10 = vld [vmem:[%s2283_s7 + $0x78] sm:$0xff] }
  0xc9   : > { %1359 = vmatprep.subr.bf16.mxu1 %v1606_v12 }
  0xcb   : > { %1340 = vmatpush3.bf16.msra.mxu0 %v1605_v11  ;;  %v868_v11 = vld [vmem:[%s2283_s7 + $0x48] sm:$0xff] }
  0xcc   : > { %1360 = vmatpush3.bf16.msra.mxu1 %v1606_v12  ;;  %1341 = vmatprep.subr.bf16.mxu0 %v1607_v15 }
  0xcd   : > { %1361 = vmatprep.subr.bf16.mxu1 %v1608_v16 }
  0xcf   : > { %1342 = vmatpush3.bf16.msra.mxu0 %v1607_v15 }
  0xd0   : > { %1362 = vmatpush3.bf16.msra.mxu1 %v1608_v16  ;;  %1343 = vmatprep.subr.bf16.mxu0 %v1609_v17  ;;  %v872_v16 = vld [vmem:[%s2283_s7 + $0x68] sm:$0xff] }
  0xd1   : > { %1363 = vmatprep.subr.bf16.mxu1 %v1610_v18 }
  0xd3   : > { %1344 = vmatpush3.bf16.msra.mxu0 %v1609_v17 }
  0xd4   : > { %1364 = vmatpush3.bf16.msra.mxu1 %v1610_v18  ;;  %1369 = vmatprep.subr.bf16.mxu0 %v1615_v19 }
  0xd5   : > { %1389 = vmatprep.subr.bf16.mxu1 %v1616_v20 }
  0xd6   : > { %1346 = vmatmul.mubr.bf16.vlgmr.msra.gmra.mrb[0].mxu0 %v1613_v21 }
  0xd7   : > { %1366 = vmatmul.mubr.bf16.vlgmr.msra.gmra.mrb[0].mxu1 %v1614_v22  ;;  %1370 = vmatpush3.bf16.msra.mxu0 %v1615_v19 }
  0xd8   : > { %1390 = vmatpush3.bf16.msra.mxu1 %v1616_v20  ;;  %1371 = vmatprep.subr.bf16.mxu0 %v1617_v23 }
  0xd9   : > { %1391 = vmatprep.subr.bf16.mxu1 %v1618_v24  ;;  %1385 = vmatprep.mubr.bf16.mxu0 %v1631_v27 }
  0xda   : > { %1405 = vmatprep.mubr.bf16.mxu1 %v1632_v28 }
  0xdb   : > { %1372 = vmatpush3.bf16.msra.mxu0 %v1617_v23 }
  0xdc   : > { %1392 = vmatpush3.bf16.msra.mxu1 %v1618_v24  ;;  %1373 = vmatprep.subr.bf16.mxu0 %v1619_v25 }
  0xdd   : > { %1393 = vmatprep.subr.bf16.mxu1 %v1620_v26 }
  0xdf   : > { %1374 = vmatpush3.bf16.msra.mxu0 %v1619_v25 }
  0xe0   : > { %1394 = vmatpush3.bf16.msra.mxu1 %v1620_v26  ;;  %1375 = vmatprep.subr.bf16.mxu0 %v1621_v29  ;;  %v1280_v26 = vld [vmem:[%s2229_s5] ss:$0 sm:$0xff] (!%p1279_p8) }
  0xe1   : > { %1395 = vmatprep.subr.bf16.mxu1 %v1622_v30 }
  0xe3   : > { %1376 = vmatpush3.bf16.msra.mxu0 %v1621_v29 }
  0xe4   : > { %1396 = vmatpush3.bf16.msra.mxu1 %v1622_v30  ;;  %1377 = vmatprep.subr.bf16.mxu0 %v1623_v31 }
  0xe5   : > { %1397 = vmatprep.subr.bf16.mxu1 %v1624_v32 }
  0xe7   : > { %1378 = vmatpush3.bf16.msra.mxu0 %v1623_v31 }
  0xe8   : > { %1398 = vmatpush3.bf16.msra.mxu1 %v1624_v32  ;;  %1379 = vmatprep.subr.bf16.mxu0 %v1625_v33 }
  0xe9   : > { %1399 = vmatprep.subr.bf16.mxu1 %v1626_v34 }
  0xeb   : > { %1380 = vmatpush3.bf16.msra.mxu0 %v1625_v33 }
  0xec   : > { %1400 = vmatpush3.bf16.msra.mxu1 %v1626_v34  ;;  %1381 = vmatprep.subr.bf16.mxu0 %v1627_v35 }
  0xed   : > { %1401 = vmatprep.subr.bf16.mxu1 %v1628_v36 }
  0xef   : > { %1382 = vmatpush3.bf16.msra.mxu0 %v1627_v35 }
  0xf0   : > { %1402 = vmatpush3.bf16.msra.mxu1 %v1628_v36  ;;  %1383 = vmatprep.subr.bf16.mxu0 %v1629_v37 }
  0xf1   : > { %1403 = vmatprep.subr.bf16.mxu1 %v1630_v38 }
  0xf3   : > { %1384 = vmatpush3.bf16.msra.mxu0 %v1629_v37 }
  0xf4   : > { %1404 = vmatpush3.bf16.msra.mxu1 %v1630_v38 }
  0xf6   : > { %1386 = vmatmul.mubr.bf16.vlgmr.msra.gmra.mrb[4].mxu0 %v1633_v39 }
  0xf7   : > { %1406 = vmatmul.mubr.bf16.vlgmr.msra.gmra.mrb[4].mxu1 %v1634_v40 }
 0x1a9   : > { %v1347_v44 = vpop.f32.mrb[0].mxu0 }
 0x1aa   : > { %v877_v47 = vadd.f32 %v1347_v44, %v861_v41  ;;  %v1367_v48 = vpop.f32.mrb[0].mxu1  ;;  %v452_v49 = vpop.f32.mrb[1].mxu0 }
 0x1ab   : > { %v881_v52 = vadd.f32 %v1367_v48, %v865_v42  ;;  %v875_v53 = vadd.f32 %v859_v43, %v452_v49  ;;  %v582_v54 = vpop.f32.mrb[1].mxu1  ;;  %v1348_v55 = vpop.f32.mrb[2].mxu0 }
 0x1ac   : > { %893 = vst [vmem:[%s2283_s7 + $0x10] sm:$0xff] %v877_v47  ;;  %v879_v57 = vadd.f32 %v863_v45, %v582_v54  ;;  %v878_v58 = vadd.f32 %v1348_v55, %v862_v46  ;;  %v1368_v59 = vpop.f32.mrb[2].mxu1  ;;  %v455_v60 = vpop.f32.mrb[3].mxu0 }
 0x1ad   : > { %897 = vst [vmem:[%s2283_s7 + $0x30] sm:$0xff] %v881_v52  ;;  %891 = vst [vmem:[%s2283_s7] sm:$0xff] %v875_v53  ;;  %v882_v61 = vadd.f32 %v1368_v59, %v866_v50  ;;  %v876_v62 = vadd.f32 %v860_v51, %v455_v60  ;;  %v585_v63 = vpop.f32.mrb[3].mxu1 }
 0x1ae   : > { %895 = vst [vmem:[%s2283_s7 + $0x20] sm:$0xff] %v879_v57  ;;  %894 = vst [vmem:[%s2283_s7 + $0x18] sm:$0xff] %v878_v58  ;;  %v880_v0 = vadd.f32 %v864_v56, %v585_v63 }
 0x1af   : > { %898 = vst [vmem:[%s2283_s7 + $0x38] sm:$0xff] %v882_v61  ;;  %892 = vst [vmem:[%s2283_s7 + $0x8] sm:$0xff] %v876_v62 }
 0x1b0   : > { %896 = vst [vmem:[%s2283_s7 + $0x28] sm:$0xff] %v880_v0 }
 0x1b3   : > { %v913_v30 = vld [vmem:[%s2283_s7 + $0x10] sm:$0xff] (!%p1279_p8) }
 0x1b4   : > { %v911_v25 = vld [vmem:[%s2283_s7] sm:$0xff] (!%p1279_p8)  ;;  %v936_v33 = vmul.f32 (!%p1279_p8), %v1280_v26, %v913_v30  ;;  %v917_v43 = vld [vmem:[%s2283_s7 + $0x30] sm:$0xff] (!%p1279_p8) }
 0x1b5   : > { %v934_v28 = vmul.f32 (!%p1279_p8), %v1280_v26, %v911_v25  ;;  %v914_v34 = vld [vmem:[%s2283_s7 + $0x18] sm:$0xff] (!%p1279_p8)  ;;  %v915_v37 = vld [vmem:[%s2283_s7 + $0x20] sm:$0xff] (!%p1279_p8)  ;;  %v940_v45 = vmul.f32 (!%p1279_p8), %v1280_v26, %v917_v43 }
 0x1b6   : > { %v912_v27 = vld [vmem:[%s2283_s7 + $0x8] sm:$0xff] (!%p1279_p8)  ;;  %v952_v35 = vmax.f32 (!%p1279_p8), %v936_v33, 0.0  ;;  %v937_v36 = vmul.f32 (!%p1279_p8), %v1280_v26, %v914_v34  ;;  %v938_v39 = vmul.f32 (!%p1279_p8), %v1280_v26, %v915_v37  ;;  %v918_v46 = vld [vmem:[%s2283_s7 + $0x38] sm:$0xff] (!%p1279_p8) }
 0x1b7   : > { %v935_v29 = vmul.f32 (!%p1279_p8), %v1280_v26, %v912_v27  ;;  %v950_v31 = vmax.f32 (!%p1279_p8), %v934_v28, 0.0  ;;  %v916_v40 = vld [vmem:[%s2283_s7 + $0x28] sm:$0xff] (!%p1279_p8)  ;;  %v956_v47 = vmax.f32 (!%p1279_p8), %v940_v45, 0.0  ;;  %v941_v48 = vmul.f32 (!%p1279_p8), %v1280_v26, %v918_v46 }
 0x1b8   : > { %v953_v38 = vmax.f32 (!%p1279_p8), %v937_v36, 0.0  ;;  %v954_v41 = vmax.f32 (!%p1279_p8), %v938_v39, 0.0  ;;  %v939_v42 = vmul.f32 (!%p1279_p8), %v1280_v26, %v916_v40 }
 0x1b9   : > { %966 = vxpose.xlu0.b32.start [1/16] (!%p1279_p8), %v950_v31, 128  ;;  %v951_v32 = vmax.f32 (!%p1279_p8), %v935_v29, 0.0  ;;  %v957_v50 = vmax.f32 (!%p1279_p8), %v941_v48, 0.0 }
 0x1ba   : > { %v955_v44 = vmax.f32 (!%p1279_p8), %v939_v42, 0.0 }
 0x1bd   : > { %967 = vxpose.xlu0.b32.cont [2/16] (!%p1279_p8), %v951_v32, 128 }
 0x1c1   : > { %968 = vxpose.xlu0.b32.cont [3/16] (!%p1279_p8), %v952_v35, 128 }
 0x1c5   : > { %969 = vxpose.xlu0.b32.cont [4/16] (!%p1279_p8), %v953_v38, 128 }
 0x1c9   : > { %v1387_v4 = vpop.f32.mrb[4].mxu0  ;;  %970 = vxpose.xlu0.b32.cont [5/16] (!%p1279_p8), %v954_v41, 128 }
 0x1ca   : > { %v885_v7 = vadd.f32 %v1387_v4, %v869_v1  ;;  %v1407_v8 = vpop.f32.mrb[4].mxu1  ;;  %v712_v9 = vpop.f32.mrb[5].mxu0  ;;  %910 = sbr.rel (%p1279_p8) target bundleno = 631 (0x277), region = 52 }
 0x1cb   : > { %v889_v12 = vadd.f32 %v1407_v8, %v873_v2  ;;  %v883_v13 = vadd.f32 %v867_v3, %v712_v9  ;;  %v842_v14 = vpop.f32.mrb[5].mxu1  ;;  %v1388_v15 = vpop.f32.mrb[6].mxu0 }
 0x1cc   : > { %901 = vst [vmem:[%s2283_s7 + $0x50] sm:$0xff] %v885_v7  ;;  %v887_v17 = vadd.f32 %v871_v5, %v842_v14  ;;  %v886_v18 = vadd.f32 %v1388_v15, %v870_v6  ;;  %v1408_v19 = vpop.f32.mrb[6].mxu1  ;;  %v715_v20 = vpop.f32.mrb[7].mxu0 }
 0x1cd   : > { %905 = vst [vmem:[%s2283_s7 + $0x70] sm:$0xff] %v889_v12  ;;  %899 = vst [vmem:[%s2283_s7 + $0x40] sm:$0xff] %v883_v13  ;;  %v890_v21 = vadd.f32 %v1408_v19, %v874_v10  ;;  %v884_v22 = vadd.f32 %v868_v11, %v715_v20  ;;  %v845_v23 = vpop.f32.mrb[7].mxu1  ;;  %971 = vxpose.xlu0.b32.cont [6/16] (!%p1279_p8), %v955_v44, 128 }
 0x1ce   : > { %903 = vst [vmem:[%s2283_s7 + $0x60] sm:$0xff] %v887_v17  ;;  %902 = vst [vmem:[%s2283_s7 + $0x58] sm:$0xff] %v886_v18  ;;  %v888_v24 = vadd.f32 %v872_v16, %v845_v23 }
 0x1cf   : > { %906 = vst [vmem:[%s2283_s7 + $0x78] sm:$0xff] %v890_v21  ;;  %900 = vst [vmem:[%s2283_s7 + $0x48] sm:$0xff] %v884_v22 }
 0x1d0   : > { %904 = vst [vmem:[%s2283_s7 + $0x68] sm:$0xff] %v888_v24 }
 0x1d1   : > { %972 = vxpose.xlu0.b32.cont [7/16] %v956_v47, 128 }
 0x1d3   : > { %v921_v55 = vld [vmem:[%s2283_s7 + $0x50] sm:$0xff] }
 0x1d4   : > { %v919_v49 = vld [vmem:[%s2283_s7 + $0x40] sm:$0xff]  ;;  %v944_v57 = vmul.f32 %v1280_v26, %v921_v55  ;;  %v925_v3 = vld [vmem:[%s2283_s7 + $0x70] sm:$0xff] }
 0x1d5   : > { %v942_v51 = vmul.f32 %v1280_v26, %v919_v49  ;;  %973 = vxpose.xlu0.b32.cont [8/16] %v957_v50, 128  ;;  %v922_v58 = vld [vmem:[%s2283_s7 + $0x58] sm:$0xff]  ;;  %v923_v61 = vld [vmem:[%s2283_s7 + $0x60] sm:$0xff]  ;;  %v948_v5 = vmul.f32 %v1280_v26, %v925_v3 }
 0x1d6   : > { %v920_v52 = vld [vmem:[%s2283_s7 + $0x48] sm:$0xff]  ;;  %v960_v59 = vmax.f32 %v944_v57, 0.0  ;;  %v945_v60 = vmul.f32 %v1280_v26, %v922_v58  ;;  %v946_v63 = vmul.f32 %v1280_v26, %v923_v61  ;;  %v926_v6 = vld [vmem:[%s2283_s7 + $0x78] sm:$0xff] }
 0x1d7   : > { %v958_v53 = vmax.f32 %v942_v51, 0.0  ;;  %v943_v54 = vmul.f32 %v1280_v26, %v920_v52  ;;  %v924_v0 = vld [vmem:[%s2283_s7 + $0x68] sm:$0xff]  ;;  %v964_v7 = vmax.f32 %v948_v5, 0.0  ;;  %v949_v8 = vmul.f32 %v1280_v26, %v926_v6 }
 0x1d8   : > { %v961_v62 = vmax.f32 %v945_v60, 0.0  ;;  %v962_v1 = vmax.f32 %v946_v63, 0.0  ;;  %v947_v2 = vmul.f32 %v1280_v26, %v924_v0 }
 0x1d9   : > { %974 = vxpose.xlu0.b32.cont [9/16] %v958_v53, 128  ;;  %v959_v56 = vmax.f32 %v943_v54, 0.0  ;;  %v965_v9 = vmax.f32 %v949_v8, 0.0 }
 0x1da   : > { %v963_v4 = vmax.f32 %v947_v2, 0.0 }
 0x1dd   : > { %975 = vxpose.xlu0.b32.cont [10/16] %v959_v56, 128 }
 0x1e1   : > { %976 = vxpose.xlu0.b32.cont [11/16] %v960_v59, 128 }
 0x1e5   : > { %977 = vxpose.xlu0.b32.cont [12/16] %v961_v62, 128 }
 0x1e9   : > { %978 = vxpose.xlu0.b32.cont [13/16] %v962_v1, 128 }
 0x1ed   : > { %979 = vxpose.xlu0.b32.cont [14/16] %v963_v4, 128 }
 0x1f1   : > { %980 = vxpose.xlu0.b32.cont [15/16] %v964_v7, 128 }
 0x1f5   : > { %981 = vxpose.xlu0.b32.end [16/16] %v965_v9, 128 }
 0x239   : > { %v982_v10 = vpop.trf.xlu0 }
 0x23a   : > { %998 = vst [vmem:[%s2238_s26] sm:$0xff] %v982_v10 }
 0x23d   : > { %v983_v11 = vpop.trf.xlu0 }
 0x23e   : > { %999 = vst [vmem:[%s2238_s26 + $0x8] sm:$0xff] %v983_v11 }
 0x241   : > { %v984_v12 = vpop.trf.xlu0 }
 0x242   : > { %1000 = vst [vmem:[%s2238_s26 + $0x10] sm:$0xff] %v984_v12 }
 0x245   : > { %v985_v13 = vpop.trf.xlu0 }
 0x246   : > { %1001 = vst [vmem:[%s2238_s26 + $0x18] sm:$0xff] %v985_v13 }
 0x249   : > { %v986_v14 = vpop.trf.xlu0 }
 0x24a   : > { %1002 = vst [vmem:[%s2238_s26 + $0x20] sm:$0xff] %v986_v14 }
 0x24d   : > { %v987_v15 = vpop.trf.xlu0 }
 0x24e   : > { %1003 = vst [vmem:[%s2238_s26 + $0x28] sm:$0xff] %v987_v15 }
 0x251   : > { %v988_v16 = vpop.trf.xlu0 }
 0x252   : > { %1004 = vst [vmem:[%s2238_s26 + $0x30] sm:$0xff] %v988_v16 }
 0x255   : > { %v989_v17 = vpop.trf.xlu0 }
 0x256   : > { %1005 = vst [vmem:[%s2238_s26 + $0x38] sm:$0xff] %v989_v17 }
 0x259   : > { %v990_v18 = vpop.trf.xlu0 }
 0x25a   : > { %1006 = vst [vmem:[%s2238_s26 + $0x40] sm:$0xff] %v990_v18 }
 0x25d   : > { %v991_v19 = vpop.trf.xlu0 }
 0x25e   : > { %1007 = vst [vmem:[%s2238_s26 + $0x48] sm:$0xff] %v991_v19 }
 0x261   : > { %v992_v20 = vpop.trf.xlu0 }
 0x262   : > { %1008 = vst [vmem:[%s2238_s26 + $0x50] sm:$0xff] %v992_v20 }
 0x265   : > { %v993_v21 = vpop.trf.xlu0 }
 0x266   : > { %1009 = vst [vmem:[%s2238_s26 + $0x58] sm:$0xff] %v993_v21 }
 0x269   : > { %v994_v22 = vpop.trf.xlu0 }
 0x26a   : > { %1010 = vst [vmem:[%s2238_s26 + $0x60] sm:$0xff] %v994_v22 }
 0x26d   : > { %v995_v23 = vpop.trf.xlu0 }
 0x26e   : > { %1011 = vst [vmem:[%s2238_s26 + $0x68] sm:$0xff] %v995_v23 }
 0x271   : > { %v996_v24 = vpop.trf.xlu0 }
 0x272   : > { %1012 = vst [vmem:[%s2238_s26 + $0x70] sm:$0xff] %v996_v24 }
 0x275   : > { %v997_v25 = vpop.trf.xlu0 }
 0x276   : > { %1013 = vst [vmem:[%s2238_s26 + $0x78] sm:$0xff] %v997_v25 }
 0x277 PF: > { %s2514_s10 = sld [smem:[#allocation22_spill]]  ;;  %s2515_s8 = sld [smem:[#allocation20_spill]] }
 0x278   : > { %s2516_s11 = sld [smem:[#allocation32_spill]]  ;;  %s1030_s0 = sshll.u32 %s2238_s26, 4  ;;  %s2354_s0 = int_to_ptr.vmem [resolvable:$true] %s1030_s0 }
 0x279   : > { %s2517_s6 = sld [smem:[#allocation35_spill]]  ;;  %s2363_s15 = scalar_lea.sflag [#allocation5], %s310_s4 }
 0x27a   : > { %s1691_s23 = scalar_lea.vmem %s2354_s0, 2048  ;;  %s1900_s26 = smov [#allocation9]  }
 0x27b   : > { %p1692_p10 = scmp.ne.s32.totalorder %s2354_s0, %s1691_s23  ;;  %s1695_s3 = sshll.u32 %s1900_s26, 4  ;;  %s1696_s3 = int_to_ptr.vmem [resolvable:$false] %s1695_s3 }
 0x27c   : > { %s1697_s9 = scalar_lea.vmem %s1696_s3, 4096  ;;  %p1698_p13 = scmp.lt.s32.totalorder %s2354_s0, %s1696_s3 }
 0x27d   : > { %s1288_s12 = sshll.u32 %s2514_s10, 5  ;;  %p1699_p4 = scmp.lt.s32.totalorder %s1697_s9, %s1691_s23 }
 0x27e   : > { %s1027_s18 = sadd.s32 %s2515_s8, %s1288_s12  ;;  %p2518_p12 = scmp.ne.s32.totalorder %s2516_s11, 0 }
 0x27f   : > { %s1284_s21 = sshll.u32 %s1027_s18, 7  ;;  %p1700_p0 = por %p1699_p4, %p1698_p13 }
 0x280   : > { %s2359_s14 = scalar_lea.hbm %s2517_s6, %s1284_s21  ;;  %p1693_p2 = pnand %p1692_p10, %p2518_p12 }
 0x282   : > { %p1694_p5 = pneg %p1693_p2 }
 0x284   : > { %p1701_p9 = pnand %p1700_p0, %p1694_p5 }
 0x286   : > { %1704 = shalt.err (!%p1701_p9)
}
 0x287   : > { %s1705_s4 = scalar_lea.hbm %s2359_s14, 2048  ;;  %s1709_s24 = scalar_lea.hbm %s2517_s6, 8192 }
 0x288   : > { %p1706_p1 = scmp.ne.s32.totalorder %s2359_s14, %s1705_s4  ;;  %p1710_p3 = scmp.lt.u32.totalorder %s2359_s14, %s2517_s6 }
 0x289   : > { %p1711_p6 = scmp.lt.u32.totalorder %s1709_s24, %s1705_s4  ;;  %p1713_p10 = scmp.lt.u32.totalorder %s1705_s4, %s2359_s14 }
 0x28a   : > { %p1707_p11 = pnand %p1706_p1, %p2518_p12 }
 0x28b   : > { %p1712_p8 = por %p1711_p6, %p1710_p3 }
 0x28c   : > { %p1708_p7 = pneg %p1707_p11 }
 0x28d   : > { %p1714_p2 = por %p1713_p10, %p1712_p8 }
 0x28f   : > { %p1715_p5 = pnand %p1714_p2, %p1708_p7 }
 0x291   : > { %1718 = shalt.err (!%p1715_p5)
}
 0x292   : > { %s1901_s12 = smov 128   ;;  %s1902_s18 = smov 256  }
 0x293   : > { %s1903_s21 = smov 8  }
 0x294   : > { %1422 = dma.vmem_to_hbm [thread:$0]  (%p2518_p12), %s2354_s0, 2048, %s2359_s14, %s2363_s15, %s1901_s12, %s1902_s18, %s1903_s21  }
 0x295 PF: > { %s2519_s25 = sld [smem:[#allocation17_spill]]  ;;  %s2520_s5 = sld [smem:[#allocation33_spill]] }
 0x296   : > { %p1428_p13 = scmp.ge.s32.totalorder %s1885_s30, 2 }
 0x29b   : > { %s1045_s23 = sand.u32 1, %s2519_s25   ;;  %p2521_p4 = scmp.ne.s32.totalorder %s2520_s5, 0 }
 0x29c   : > { %s1046_s26 = scalar_lea.sflag [#allocation5], %s1045_s23 }
 0x29d   : > { %p1425_p0 = pnand %p1428_p13, %p2521_p4 }
 0x29f   : > { %1808 = dma.done.wait (!%p1425_p0), %s1046_s26, 2048  }
 0x2a0   : > { %1810 = vsyncadd (!%p1425_p0), %s1046_s26, 4294965248  ;;  %s22_s30 = sadd.s32 1, %s1885_s30   ;;  %s2523_s11 = sld [smem:[#allocation18_spill]] }
 0x2a1   : > { %p2392_p9 = scmp.ge.s32.totalorder %s22_s30, 10   ;;  %s2524_s14 = sld [smem:[#allocation31_spill]] }
 0x2a2   : > { %s2525_s0 = sld [smem:[#allocation30_spill]]  ;;  %s2526_s9 = sld [smem:[#allocation29_spill]] }
 0x2a3   : > { %s2527_s4 = sld [smem:[#allocation19_spill]]  ;;  %s2528_s23 = sld [smem:[#allocation27_spill]] }
 0x2a4   : > { %s2529_s24 = sld [smem:[#allocation23_spill]]  ;;  %s2530_s27 = sld [smem:[#allocation24_spill]] }
 0x2a5   : > { %s2531_s12 = smov %s1817_s13  ;;  %s2532_s7 = sld [smem:[#allocation25_spill]] }
 0x2a6   : > { %s2533_s13 = smov %s2523_s11  ;;  %s2534_s10 = sld [smem:[#allocation26_spill]] }
 0x2a7   : > { %s2535_s15 = smov %s1829_s16  ;;  %s2536_s16 = smov %s1833_s17 }
 0x2a8   : > { %s2537_s17 = smov %s2525_s0  ;;  %s2538_s18 = smov %s1841_s19 }
 0x2a9   : > { %s2539_s19 = smov %s1845_s20  ;;  %s2540_s20 = smov %s2526_s9 }
 0x2aa   : > { %s2541_s21 = smov %s1853_s22  ;;  %s2542_s22 = smov %s2527_s4 }
 0x2ab   : > { %s2543_s25 = smov %s1877_s28  ;;  %s2544_s26 = smov %s1881_s29 }
 0x2ac   : > { %s2545_s28 = smov %s2532_s7  ;;  %s2546_s29 = smov %s2534_s10 }
 0x2ad   :  { %21 = sbr.rel (!%p2392_p9) target bundleno = 18 (0x12), region = 119 }
 0x2b4   :  { %1051 = vsyncpa [#allocation4], 1 }
 0x2b5   :  { %1053 = vsyncpa [#allocation4 + $0x1], 1 }
 0x2b6   :  { %1054 = vsyncpa [#allocation7], 1 }
 0x2b7   :  { %1056 = vsyncpa [#allocation7 + $0x1], 1 }
 0x2b8   :  { %1057 = vsyncpa [#allocation5], 1 }
 0x2b9   :  { %1059 = vsyncpa [#allocation5 + $0x1], 1 }

</bundles_post_ra>
